<compile_context>
chip_gen: v7x
topology: tpu7x:2x2x1
jax: 0.10.0
libtpu: 0.0.40
codegen_flags: <defaults>
</compile_context>

<pallas_src>
import jax
import jax.numpy as jnp
from jax.experimental import pallas as pl
from jax.experimental.pallas import tpu as pltpu


def _max_identity(dtype):
    """Identity element for max-reduction in the given dtype."""
    if jnp.issubdtype(dtype, jnp.floating):
        return float("-inf")
    return int(jnp.iinfo(dtype).min)


def _choose_tiles(r, l, itemsize):
    """Pick (row_tile, l_tile, out_width) blocks that are VMEM-safe on all gens."""
    if l >= 128:
        tl = min(2048, ((l + 127) // 128) * 128)   # multiple of 128 lanes
        ow = 128                                   # lane-dense partial-max width
    else:
        tl = l                                     # full-extent tiny L block
        ow = l
    # ~4 MiB per input block (8 MiB double-buffered) -> comfortably under the
    # scoped VMEM defaults on v5e/v6e/v7x; rows rounded to a multiple of 8.
    target_block_bytes = 4 * 1024 * 1024
    tr = target_block_bytes // max(1, tl * itemsize)
    tr = max(8, min(1024, (tr // 8) * 8))
    if r <= tr:
        tr = r                                     # full-extent row block
    return tr, tl, ow


def _make_kernel(l, tl, ow, neg, needs_mask):
    n_chunks = tl // ow  # number of `ow`-wide lane chunks per L tile (exact)

    def _fold(x):
        # Tree-fold the TL-wide tile down to `ow` lanes with VPU maximums only
        # (static 128-aligned lane slices -> cheap vreg selection, no XLU;
        #  pairwise tree keeps the dependency chain at log2(n_chunks)).
        chunks = [x[:, j * ow:(j + 1) * ow] for j in range(n_chunks)]
        while len(chunks) > 1:
            nxt = [jnp.maximum(a, b) for a, b in zip(chunks[::2], chunks[1::2])]
            if len(chunks) % 2:
                nxt.append(chunks[-1])
            chunks = nxt
        return chunks[0]

    def kernel(x_ref, o_ref):
        k = pl.program_id(1)
        last = pl.num_programs(1) - 1

        # First L step for this row block: init the resident output tile to
        # the max-identity (it doubles as the accumulator).
        @pl.when(k == 0)
        def _init():
            o_ref[...] = jnp.full(o_ref.shape, neg, dtype=o_ref.dtype)

        if needs_mask:
            # Interior tiles: unmasked hot path (pure maximum folding).
            @pl.when(k < last)
            def _body():
                o_ref[...] = jnp.maximum(o_ref[...], _fold(x_ref[...]))

            # Tail tile only: mask lanes past the true length L so OOB /
            # padded garbage never enters the max. VPU compare+select, but it
            # runs for a single grid step per row block.
            @pl.when(k == last)
            def _tail():
                x = x_ref[...]
                col = k * tl + jax.lax.broadcasted_iota(jnp.int32, x.shape, 1)
                x = jnp.where(col < l, x, jnp.asarray(neg, dtype=x.dtype))
                o_ref[...] = jnp.maximum(o_ref[...], _fold(x))
        else:
            o_ref[...] = jnp.maximum(o_ref[...], _fold(x_ref[...]))

    return kernel


def _global_max_pool1d_impl(x: jax.Array) -> jax.Array:
    """Pallas equivalent of GlobalMaxPool1d.forward: (N, C, L) -> (N, C, 1)."""
    n, c, l = x.shape
    r = n * c
    x2 = x.reshape(r, l)                      # free reshape (contiguous)
    itemsize = jnp.dtype(x.dtype).itemsize

    tr, tl, ow = _choose_tiles(r, l, itemsize)
    neg = _max_identity(x.dtype)
    needs_mask = (l % tl) != 0
    grid = (pl.cdiv(r, tr), pl.cdiv(l, tl))   # rows (parallel), L (reduction)

    kernel = _make_kernel(l, tl, ow, neg, needs_mask)

    cost = pl.CostEstimate(
        flops=r * l,                          # one compare per element
        transcendentals=0,
        bytes_accessed=r * l * itemsize + r * ow * itemsize,
    )

    out2 = pl.pallas_call(
        kernel,
        out_shape=jax.ShapeDtypeStruct((r, ow), x.dtype),
        grid_spec=pltpu.PrefetchScalarGridSpec(
            num_scalar_prefetch=0,
            grid=grid,
            in_specs=[pl.BlockSpec((tr, tl), lambda i, k: (i, k))],
            out_specs=pl.BlockSpec((tr, ow), lambda i, k: (i, 0)),
        ),
        compiler_params=pltpu.CompilerParams(
            dimension_semantics=("parallel", "arbitrary"),
            vmem_limit_bytes=32 * 1024 * 1024,
        ),
        cost_estimate=cost,
    )(x2)

    # Finish the <=128-wide lane reduction of the lane-dense partial maxes
    # (tiny vs. the streamed input; keeps the hot kernel free of XLU reduces
    # and width-1 masked stores).
    out = jnp.max(out2, axis=-1) if ow > 1 else out2[:, 0]
    return out.reshape(n, c, 1)


# jit so the reshape + final tiny cross-lane max fuse around the pallas_call.
global_max_pool1d = jax.jit(_global_max_pool1d_impl)


if __name__ == "__main__":
    key = jax.random.PRNGKey(0)

    # Shape implied by the module's forward (small, deterministic).
    batch, channels, length = 2, 4, 16
    x = jax.random.normal(key, (batch, channels, length), dtype=jnp.float32)
    out = jax.block_until_ready(global_max_pool1d(x))
    ref = jnp.max(x, axis=-1, keepdims=True)
    assert out.shape == (batch, channels, 1), out.shape
    assert jnp.allclose(out, ref), "mismatch vs reference (small shape)"

    # Extra checks that exercise the tiled / masked / multi-step reduction paths.
    for (b2, c2, l2) in ((4, 24, 700), (2, 8, 4160), (3, 40, 2048)):
        key, sub = jax.random.split(key)
        x2 = jax.random.normal(sub, (b2, c2, l2), dtype=jnp.float32)
        o2 = jax.block_until_ready(global_max_pool1d(x2))
        r2 = jnp.max(x2, axis=-1, keepdims=True)
        assert o2.shape == (b2, c2, 1), o2.shape
        assert jnp.allclose(o2, r2), f"mismatch vs reference at {(b2, c2, l2)}"

    print("KERNEL_OK")
</pallas_src>

<mosaic_0001>
module attributes {stable_mosaic.version = 11 : i64} {
  func.func @kernel(%arg0: i32, %arg1: i32, %arg2: memref<8x16xf32, #tpu.memory_space<vmem>>, %arg3: memref<8x16xf32, #tpu.memory_space<vmem>>) attributes {dimension_semantics = [#tpu.dimension_semantics<parallel>, #tpu.dimension_semantics<arbitrary>], iteration_bounds = array<i64: 1, 1>, scalar_prefetch = 0 : i64, scratch_operands = 0 : i64, tpu.core_type = #tpu.core_type<tc>, window_params = [{transform_indices = @transform_0, window_bounds = array<i64: 8, 16>}, {transform_indices = @transform_1, window_bounds = array<i64: 8, 16>}]} {
    %c0_i32 = arith.constant 0 : i32
    %0 = arith.cmpi eq, %arg1, %c0_i32 : i32
    %1 = arith.extui %0 : i1 to i32
    %c0_i32_0 = arith.constant 0 : i32
    %2 = arith.cmpi ne, %1, %c0_i32_0 : i32
    scf.if %2 {
      %cst = arith.constant 0xFF800000 : f32
      %7 = vector.broadcast %cst : f32 to vector<8x16xf32>
      %c0_6 = arith.constant 0 : index
      %c0_7 = arith.constant 0 : index
      %8 = vector.load %arg3[%c0_6, %c0_7] : memref<8x16xf32, #tpu.memory_space<vmem>>, vector<8x16xf32>
      tpu.vector_store %arg3[%c0_6, %c0_7], %7 {strides = array<i32>} : memref<8x16xf32, #tpu.memory_space<vmem>>, vector<8x16xf32>,
    } else {
    }
    %c0 = arith.constant 0 : index
    %c0_1 = arith.constant 0 : index
    %3 = vector.load %arg3[%c0, %c0_1] : memref<8x16xf32, #tpu.memory_space<vmem>>, vector<8x16xf32>
    %c0_2 = arith.constant 0 : index
    %c0_3 = arith.constant 0 : index
    %4 = vector.load %arg2[%c0_2, %c0_3] : memref<8x16xf32, #tpu.memory_space<vmem>>, vector<8x16xf32>
    %5 = arith.maximumf %3, %4 : vector<8x16xf32>
    %c0_4 = arith.constant 0 : index
    %c0_5 = arith.constant 0 : index
    %6 = vector.load %arg3[%c0_4, %c0_5] : memref<8x16xf32, #tpu.memory_space<vmem>>, vector<8x16xf32>
    tpu.vector_store %arg3[%c0_4, %c0_5], %5 {strides = array<i32>} : memref<8x16xf32, #tpu.memory_space<vmem>>, vector<8x16xf32>,
    return
  }
  func.func @transform_0(%arg0: i32, %arg1: i32) -> (i32, i32) {
    %c0_i32 = arith.constant 0 : i32
    return %arg0, %arg1 : i32, i32
  }
  func.func @transform_1(%arg0: i32, %arg1: i32) -> (i32, i32) {
    %c0_i32 = arith.constant 0 : i32
    %c0_i32_0 = arith.constant 0 : i32
    return %arg0, %c0_i32 : i32, i32
  }
}

</mosaic_0001>

<bundles_post_ra>
// kernel: _global_max_pool1d_impl.1
= control target key start
LH: loop header
LB: loop body
LE: loop exit
PB: predicated region body
PF: predicated region fallthrough
CT: control target
= control target key end

     0   :  { %6 = vsyncpa [#allocation3], 0  ;;  %s62_s6 = smov [#allocation2]   ;;  %s95_s0 = inlined_call_operand.hbm [shape: f32[8,16], index: 0, kind: input, shape index: {}]   ;;  %s96_s1 = inlined_call_operand.vmem [shape: f32[8,16], index: 1, kind: output, shape index: {}]  }
   0x1   :  { %s13_s7 = sshll.u32 %s62_s6, 4  ;;  %s38_s10 = scalar_lea.hbm %s95_s0, 128  ;;  %s14_s7 = int_to_ptr.vmem [resolvable:$true] %s13_s7 }
   0x2   :  { %p39_p0 = scmp.ne.s32.totalorder %s95_s0, %s38_s10  ;;  %p42_p1 = scmp.lt.u32.totalorder %s38_s10, %s95_s0 }
   0x4   :  { %p44_p2 = pnand %p42_p1, %p39_p0 }
   0x6   :  { %47 = shalt.err (!%p44_p2)
}
   0x7   :  { %s48_s15 = scalar_lea.vmem %s14_s7, 128  ;;  %p53_p4 = scmp.lt.s32.totalorder %s14_s7, %s14_s7 }
   0x8   :  { %p49_p3 = scmp.ne.s32.totalorder %s14_s7, %s48_s15  ;;  %p54_p5 = scmp.lt.s32.totalorder %s48_s15, %s48_s15 }
   0xa   :  { %p55_p6 = por %p54_p5, %p53_p4 }
   0xc   :  { %p56_p7 = pnand %p55_p6, %p49_p3 }
   0xe   :  { %59 = shalt.err (!%p56_p7)
}
   0xf   :  { %16 = dma.hbm_to_vmem [thread:$0]  %s95_s0, 128, %s14_s7, [#allocation3]  }
  0x10   :  { %60 = dma.done.wait [#allocation3], 128  }
  0x11   :  { %61 = vsyncadd [#allocation3], 4294967168  ;;  %vm24_vm0 = vcmask 130048   ;;  %v63_v0 = vmov -inf   ;;  %v27_v1 = vld [vmem:[#allocation2] sm:$0xff] }
  0x12   :  { %25 = vst.msk [vmem:[%s96_s1] sm:$0xff] %vm24_vm0, %v63_v0 }
  0x19   :  { %v26_v2 = vld [vmem:[%s96_s1] sm:$0xff] }
  0x1a   :  { %v28_v3 = vmax.f32 %v26_v2, %v27_v1 }
  0x1c   :  { %30 = vst.msk [vmem:[%s96_s1] sm:$0xff] %vm24_vm0, %v28_v3 }
  0x1d   :  { %35 = vsyncpa [#allocation3], 1 }

</bundles_post_ra>
